<compile_context>
chip_gen: v7x
topology: tpu7x:2x2x1
jax: 0.10.0
libtpu: 0.0.40
codegen_flags: <defaults>
</compile_context>

<pallas_src>
import functools

import jax
import jax.numpy as jnp
import numpy as np
from jax.experimental import pallas as pl
from jax.experimental.pallas import tpu as pltpu

EPS = 1e-6                      # torchvision ViT uses LayerNorm(eps=1e-6)
SEQ_ALIGN = 128                 # pad sequence length to a lane-dense multiple
                                # (use 256 for ViT-B on v6e/v7x to fill the 256-wide MXU)


def _round_up(n, m):
    return ((n + m - 1) // m) * m


def _vmem_limit_bytes():
    """Scoped-VMEM budget derived from the device's physical VMEM capacity."""
    cap = 128 * 1024 * 1024
    try:
        info = pltpu.get_tpu_info()
        cap = int(getattr(info, "vmem_capacity_bytes", cap))
    except Exception:
        pass
    # ~75% of physical, clamped: 64 MiB part (v7x) -> 48 MiB,
    # 128 MiB parts (v5e / v6e) -> 96 MiB.
    return max(48 * 1024 * 1024, min(100 * 1024 * 1024, (cap * 3) // 4))


VMEM_LIMIT_BYTES = _vmem_limit_bytes()


def _probe_weight_pipeline_mode():
    """Single-buffer (Buffered(1)) constant-index weight inputs if the runtime
    supports it; otherwise fall back to the default double-buffering."""
    try:
        mode = pl.Buffered(1)

        def k(x_ref, w_ref, o_ref):
            o_ref[...] = x_ref[...] + w_ref[...]

        x = jnp.zeros((8, 128), jnp.float32)
        out = pl.pallas_call(
            k,
            out_shape=jax.ShapeDtypeStruct((8, 128), jnp.float32),
            grid=(2,),
            in_specs=[
                pl.BlockSpec((8, 128), lambda i: (0, 0)),
                pl.BlockSpec((8, 128), lambda i: (0, 0), pipeline_mode=mode),
            ],
            out_specs=pl.BlockSpec((8, 128), lambda i: (0, 0)),
        )(x, x)
        jax.block_until_ready(out)
        return mode
    except Exception:
        return None


WEIGHT_PIPELINE_MODE = _probe_weight_pipeline_mode()


def _const_spec(shape):
    """BlockSpec for a weight/bias that is identical at every grid step."""
    n = len(shape)
    idx = lambda *_: (0,) * n
    if WEIGHT_PIPELINE_MODE is None:
        return pl.BlockSpec(shape, idx)
    return pl.BlockSpec(shape, idx, pipeline_mode=WEIGHT_PIPELINE_MODE)


# ---------------------------------------------------------------------------
# Pallas kernels
# ---------------------------------------------------------------------------
def _layernorm(v, g, b):
    mu = jnp.mean(v, axis=-1, keepdims=True)
    var = jnp.mean((v - mu) ** 2, axis=-1, keepdims=True)
    return (v - mu) * jax.lax.rsqrt(var + EPS) * g + b


def patch_embed_kernel(x_ref, w_ref, b_ref, o_ref):
    # x: (1, N, C*p*p) bf16, w: (C*p*p, D) bf16, b: (1, D) f32 -> o: (1, N, D) f32
    o_ref[0] = (
        jnp.dot(x_ref[0], w_ref[...], preferred_element_type=jnp.float32)
        + b_ref[...]
    )


def encoder_block_kernel(
    x_ref,
    g1_ref, be1_ref,
    wq_ref, bq_ref, wk_ref, bk_ref, wv_ref, bv_ref,
    wo_ref, bo_ref,
    g2_ref, be2_ref,
    w1_ref, b1_ref, w2_ref, b2_ref,
    o_ref,
    *, num_heads, seq_len,
):
    # One batch element per grid step: x block (1, Sp, D) with Sp padded.
    x = x_ref[0]                              # (Sp, D) f32
    Sp, D = x.shape
    dh = D // num_heads
    scale = 1.0 / float(np.sqrt(dh))

    # --- pre-LN + QKV projections (bf16 MXU inputs, f32 accumulation) ---
    xn = _layernorm(x, g1_ref[...], be1_ref[...])
    xn_b = xn.astype(jnp.bfloat16)
    q = jnp.dot(xn_b, wq_ref[...], preferred_element_type=jnp.float32) + bq_ref[...]
    k = jnp.dot(xn_b, wk_ref[...], preferred_element_type=jnp.float32) + bk_ref[...]
    v = jnp.dot(xn_b, wv_ref[...], preferred_element_type=jnp.float32) + bv_ref[...]

    # Fold the attention scale into q once (instead of scaling H (Sp,Sp) tiles).
    q = q * scale

    # --- batched multi-head attention: a single relayout to (H, Sp, dh) per
    #     tensor, then two batched einsums (one MXU stream, no per-head
    #     slices and no head-output concatenate). ---
    def to_heads(t):
        return jnp.transpose(
            t.reshape(Sp, num_heads, dh), (1, 0, 2)
        ).astype(jnp.bfloat16)

    qh, kh, vh = to_heads(q), to_heads(k), to_heads(v)

    s = jnp.einsum("hqd,hkd->hqk", qh, kh,
                   preferred_element_type=jnp.float32)            # (H, Sp, Sp) f32

    # Padded key columns masked via a (1, 1, Sp) row bias (seq_len, Sp static).
    if seq_len < Sp:
        key_ids = jax.lax.broadcasted_iota(jnp.int32, (1, 1, Sp), 2)
        s = s + jnp.where(key_ids < seq_len, 0.0, -1e30).astype(jnp.float32)

    m = jnp.max(s, axis=-1, keepdims=True)
    e = jnp.exp(s - m)
    inv = pl.reciprocal(jnp.sum(e, axis=-1, keepdims=True), approx=True)
    pr = (e * inv).astype(jnp.bfloat16)                           # (H, Sp, Sp)

    o = jnp.einsum("hqk,hkd->hqd", pr, vh,
                   preferred_element_type=jnp.float32)            # (H, Sp, dh)
    o_all = jnp.transpose(o, (1, 0, 2)).reshape(Sp, D).astype(jnp.bfloat16)

    attn_out = (
        jnp.dot(o_all, wo_ref[...], preferred_element_type=jnp.float32) + bo_ref[...]
    )
    x2 = x + attn_out

    # --- pre-LN + MLP (exact GELU to match torch nn.GELU() default) ---
    xn2 = _layernorm(x2, g2_ref[...], be2_ref[...])
    h1 = (
        jnp.dot(xn2.astype(jnp.bfloat16), w1_ref[...],
                preferred_element_type=jnp.float32)
        + b1_ref[...]
    )
    h1 = jax.nn.gelu(h1, approximate=False)
    h2 = (
        jnp.dot(h1.astype(jnp.bfloat16), w2_ref[...],
                preferred_element_type=jnp.float32)
        + b2_ref[...]
    )

    o_ref[0] = x2 + h2


def head_kernel(x_ref, g_ref, b_ref, wh_ref, bh_ref, o_ref):
    # x: (B, D) class tokens. Final LayerNorm + linear head, whole batch at once.
    xn = _layernorm(x_ref[...], g_ref[...], b_ref[...])
    o_ref[...] = (
        jnp.dot(xn.astype(jnp.bfloat16), wh_ref[...],
                preferred_element_type=jnp.float32)
        + bh_ref[...]
    )


# ---------------------------------------------------------------------------
# Wrappers around pallas_call
# ---------------------------------------------------------------------------
def patch_embed(patches, w_patch, b_patch):
    B, N, Cpp = patches.shape
    D = w_patch.shape[1]
    # TODO(synk): fuse the NCHW -> (B, N, C*p*p) im2col into this call
    # (allow_input_fusion / Element-indexed BlockSpec) to avoid the HBM
    # round trip of the transposed patches.
    return pl.pallas_call(
        patch_embed_kernel,
        out_shape=jax.ShapeDtypeStruct((B, N, D), jnp.float32),
        grid=(B,),
        in_specs=[
            pl.BlockSpec((1, N, Cpp), lambda b: (b, 0, 0)),
            _const_spec(w_patch.shape),
            _const_spec(b_patch.shape),
        ],
        out_specs=pl.BlockSpec((1, N, D), lambda b: (b, 0, 0)),
        compiler_params=pltpu.CompilerParams(
            dimension_semantics=("parallel",),
            vmem_limit_bytes=VMEM_LIMIT_BYTES,
        ),
    )(patches, w_patch, b_patch)


def encoder_block(x, p, num_heads, seq_len):
    B, Sp, D = x.shape
    param_order = [
        p["ln1_g"], p["ln1_b"],
        p["wq"], p["bq"], p["wk"], p["bk"], p["wv"], p["bv"],
        p["wo"], p["bo"],
        p["ln2_g"], p["ln2_b"],
        p["w1"], p["b1"], p["w2"], p["b2"],
    ]
    x_spec = pl.BlockSpec((1, Sp, D), lambda b: (b, 0, 0))
    param_specs = [_const_spec(a.shape) for a in param_order]
    # TODO(synk): for v7x at batch==1 add a second "parallel" grid axis (query
    # tiles or heads) so both TensorCores are busy; for latency-bound small
    # batches stack the L layers into one grid=(B, L) call with the residual
    # held in VMEM scratch across the L axis.
    return pl.pallas_call(
        functools.partial(encoder_block_kernel, num_heads=num_heads, seq_len=seq_len),
        out_shape=jax.ShapeDtypeStruct((B, Sp, D), jnp.float32),
        grid=(B,),
        in_specs=[x_spec] + param_specs,
        out_specs=pl.BlockSpec((1, Sp, D), lambda b: (b, 0, 0)),
        compiler_params=pltpu.CompilerParams(
            dimension_semantics=("parallel",),
            vmem_limit_bytes=VMEM_LIMIT_BYTES,
        ),
    )(x, *param_order)


def final_head(cls_tok, p):
    B, D = cls_tok.shape
    num_classes = p["wh"].shape[1]
    return pl.pallas_call(
        head_kernel,
        out_shape=jax.ShapeDtypeStruct((B, num_classes), jnp.float32),
        compiler_params=pltpu.CompilerParams(vmem_limit_bytes=VMEM_LIMIT_BYTES),
    )(cls_tok, p["ln_g"], p["ln_b"], p["wh"], p["bh"])


def vit_forward(x, params, cfg):
    """x: (B, C, H, W) NCHW float32  ->  (B, num_classes)  (flatten(1) is a no-op)."""
    B, C, H, W = x.shape
    p, D, nheads = cfg["patch"], cfg["hidden"], cfg["heads"]
    nh, nw = H // p, W // p
    N = nh * nw
    S = N + 1
    Sp = _round_up(S, SEQ_ALIGN)

    # ---- patch extraction (glue) + conv-proj-as-matmul (Pallas) ----
    # Patches streamed to the kernel in bf16 (they feed the MXU in bf16 anyway).
    patches = x.reshape(B, C, nh, p, nw, p)
    patches = patches.transpose(0, 2, 4, 1, 3, 5)          # (B, nh, nw, C, p, p)
    patches = patches.reshape(B, N, C * p * p).astype(jnp.bfloat16)
    emb = patch_embed(patches, params["w_patch"], params["b_patch"])   # (B, N, D)

    # ---- class token + positional embedding (glue) ----
    cls = jnp.broadcast_to(params["cls"], (B, 1, D))
    h = jnp.concatenate([cls, emb], axis=1) + params["pos"]            # (B, S, D)

    # ---- pad sequence to a lane-dense multiple; padded keys masked in-kernel ----
    if Sp > S:
        h = jnp.pad(h, ((0, 0), (0, Sp - S), (0, 0)))

    # ---- transformer encoder blocks (Pallas, one kernel per block) ----
    for blk in params["blocks"]:
        h = encoder_block(h, blk, nheads, seq_len=S)

    # ---- final LN + class-token head (Pallas, whole batch in one call) ----
    cls_tok = h[:, 0, :]                                               # (B, D)
    out = final_head(cls_tok, params["head"])
    return out.reshape(out.shape[0], -1)                               # .flatten(1)


# ---------------------------------------------------------------------------
# Pure-JAX reference (for a correctness sanity check; f32 math, no padding)
# ---------------------------------------------------------------------------
def vit_forward_ref(x, params, cfg):
    B, C, H, W = x.shape
    p, D, nheads = cfg["patch"], cfg["hidden"], cfg["heads"]
    nh, nw = H // p, W // p
    N = nh * nw
    dh = D // nheads

    patches = x.reshape(B, C, nh, p, nw, p).transpose(0, 2, 4, 1, 3, 5)
    patches = patches.reshape(B, N, C * p * p)
    emb = patches @ params["w_patch"].astype(jnp.float32) + params["b_patch"]
    cls = jnp.broadcast_to(params["cls"], (B, 1, D))
    h = jnp.concatenate([cls, emb], axis=1) + params["pos"]

    def ln(v, g, b):
        mu = jnp.mean(v, axis=-1, keepdims=True)
        var = jnp.mean((v - mu) ** 2, axis=-1, keepdims=True)
        return (v - mu) * jax.lax.rsqrt(var + EPS) * g + b

    f32 = lambda a: a.astype(jnp.float32)

    for bp in params["blocks"]:
        xn = ln(h, bp["ln1_g"][0], bp["ln1_b"][0])
        q = xn @ f32(bp["wq"]) + bp["bq"][0]
        k = xn @ f32(bp["wk"]) + bp["bk"][0]
        v = xn @ f32(bp["wv"]) + bp["bv"][0]
        S = h.shape[1]
        q = q.reshape(B, S, nheads, dh).transpose(0, 2, 1, 3)
        k = k.reshape(B, S, nheads, dh).transpose(0, 2, 1, 3)
        v = v.reshape(B, S, nheads, dh).transpose(0, 2, 1, 3)
        s = jnp.einsum("bhqd,bhkd->bhqk", q, k) / jnp.sqrt(jnp.float32(dh))
        a = jax.nn.softmax(s, axis=-1)
        o = jnp.einsum("bhqk,bhkd->bhqd", a, v).transpose(0, 2, 1, 3).reshape(B, S, D)
        h = h + (o @ f32(bp["wo"]) + bp["bo"][0])
        xn2 = ln(h, bp["ln2_g"][0], bp["ln2_b"][0])
        m = jax.nn.gelu(xn2 @ f32(bp["w1"]) + bp["b1"][0], approximate=False)
        h = h + (m @ f32(bp["w2"]) + bp["b2"][0])

    hp = params["head"]
    hn = ln(h[:, 0, :], hp["ln_g"][0], hp["ln_b"][0])
    out = hn @ f32(hp["wh"]) + hp["bh"][0]
    return out.reshape(out.shape[0], -1)


# ---------------------------------------------------------------------------
# Deterministic parameter initialization (synthetic, not a checkpoint)
# ---------------------------------------------------------------------------
def init_params(key, cfg):
    C, p, D, mlp, L, S, ncls = (
        cfg["channels"], cfg["patch"], cfg["hidden"],
        cfg["mlp"], cfg["layers"], cfg["seq"], cfg["classes"],
    )
    keys = iter(jax.random.split(key, 16 * L + 16))

    def wbf16(shape, scale=0.02):   # matmul weights live in bf16
        return (scale * jax.random.normal(next(keys), shape)).astype(jnp.bfloat16)

    def wf32(shape, scale=0.02):
        return (scale * jax.random.normal(next(keys), shape)).astype(jnp.float32)

    params = {
        "w_patch": wbf16((C * p * p, D)),
        "b_patch": jnp.zeros((1, D), jnp.float32),
        "cls": wf32((1, 1, D)),
        "pos": wf32((1, S, D)),
        "blocks": [],
        "head": {
            "ln_g": jnp.ones((1, D), jnp.float32),
            "ln_b": jnp.zeros((1, D), jnp.float32),
            "wh": wbf16((D, ncls)),
            "bh": jnp.zeros((1, ncls), jnp.float32),
        },
    }
    for _ in range(L):
        params["blocks"].append({
            "ln1_g": jnp.ones((1, D), jnp.float32),
            "ln1_b": jnp.zeros((1, D), jnp.float32),
            "wq": wbf16((D, D)), "bq": jnp.zeros((1, D), jnp.float32),
            "wk": wbf16((D, D)), "bk": jnp.zeros((1, D), jnp.float32),
            "wv": wbf16((D, D)), "bv": jnp.zeros((1, D), jnp.float32),
            "wo": wbf16((D, D)), "bo": jnp.zeros((1, D), jnp.float32),
            "ln2_g": jnp.ones((1, D), jnp.float32),
            "ln2_b": jnp.zeros((1, D), jnp.float32),
            "w1": wbf16((D, mlp)), "b1": jnp.zeros((1, mlp), jnp.float32),
            "w2": wbf16((mlp, D)), "b2": jnp.zeros((1, D), jnp.float32),
        })
    return params


# ---------------------------------------------------------------------------
if __name__ == "__main__":
    cfg = dict(
        channels=3, img=32, patch=8,             # 4x4 = 16 patches, S = 17
        hidden=256, heads=2, mlp=512, layers=2,  # dh = 128 -> lane-dense heads
        classes=10,
    )
    cfg["seq"] = (cfg["img"] // cfg["patch"]) ** 2 + 1   # +1 class token = 17

    key = jax.random.PRNGKey(0)
    kx, kp = jax.random.split(key)
    x = jax.random.normal(kx, (2, cfg["channels"], cfg["img"], cfg["img"]),
                          dtype=jnp.float32)
    params = init_params(kp, cfg)

    out = jax.block_until_ready(vit_forward(x, params, cfg))
    ref = jax.block_until_ready(vit_forward_ref(x, params, cfg))

    assert out.shape == (2, cfg["classes"]), out.shape
    # bf16 matmul inputs + approx reciprocal -> looser tolerance vs f32 reference
    np.testing.assert_allclose(np.asarray(out), np.asarray(ref),
                               rtol=4e-2, atol=4e-2)

    print("KERNEL_OK")
</pallas_src>

<mosaic_0001>
module attributes {stable_mosaic.version = 11 : i64} {
  func.func @k(%arg0: i32, %arg1: memref<8x128xf32, #tpu.memory_space<vmem>>, %arg2: memref<8x128xf32, #tpu.memory_space<vmem>>, %arg3: memref<8x128xf32, #tpu.memory_space<vmem>>) attributes {dimension_semantics = [#tpu.dimension_semantics<arbitrary>], iteration_bounds = array<i64: 2>, scalar_prefetch = 0 : i64, scratch_operands = 0 : i64, tpu.core_type = #tpu.core_type<tc>, window_params = [{pipeline_mode = #tpu.pipeline_mode<synchronous>, transform_indices = @transform_0, window_bounds = array<i64: 8, 128>}, {pipeline_mode = #tpu.pipeline_mode<synchronous>, transform_indices = @transform_1, window_bounds = array<i64: 8, 128>}, {pipeline_mode = #tpu.pipeline_mode<synchronous>, transform_indices = @transform_2, window_bounds = array<i64: 8, 128>}]} {
    %c0 = arith.constant 0 : index
    %c0_0 = arith.constant 0 : index
    %0 = vector.load %arg1[%c0, %c0_0] : memref<8x128xf32, #tpu.memory_space<vmem>>, vector<8x128xf32>
    %c0_1 = arith.constant 0 : index
    %c0_2 = arith.constant 0 : index
    %1 = vector.load %arg2[%c0_1, %c0_2] : memref<8x128xf32, #tpu.memory_space<vmem>>, vector<8x128xf32>
    %2 = arith.addf %0, %1 : vector<8x128xf32>
    %c0_3 = arith.constant 0 : index
    %c0_4 = arith.constant 0 : index
    %3 = vector.load %arg3[%c0_3, %c0_4] : memref<8x128xf32, #tpu.memory_space<vmem>>, vector<8x128xf32>
    tpu.vector_store %arg3[%c0_3, %c0_4], %2 {strides = array<i32>} : memref<8x128xf32, #tpu.memory_space<vmem>>, vector<8x128xf32>,
    return
  }
  func.func @transform_0(%arg0: i32) -> (i32, i32) {
    %c0_i32 = arith.constant 0 : i32
    %c0_i32_0 = arith.constant 0 : i32
    %c0_i32_1 = arith.constant 0 : i32
    return %c0_i32, %c0_i32_0 : i32, i32
  }
  func.func @transform_1(%arg0: i32) -> (i32, i32) {
    %c0_i32 = arith.constant 0 : i32
    %c0_i32_0 = arith.constant 0 : i32
    %c0_i32_1 = arith.constant 0 : i32
    return %c0_i32, %c0_i32_0 : i32, i32
  }
  func.func @transform_2(%arg0: i32) -> (i32, i32) {
    %c0_i32 = arith.constant 0 : i32
    %c0_i32_0 = arith.constant 0 : i32
    %c0_i32_1 = arith.constant 0 : i32
    return %c0_i32, %c0_i32_0 : i32, i32
  }
}

module attributes {stable_mosaic.version = 11 : i64} {
  func.func @patch_embed_kernel(%arg0: i32, %arg1: memref<1x16x192xbf16, #tpu.memory_space<vmem>>, %arg2: memref<192x256xbf16, #tpu.memory_space<vmem>>, %arg3: memref<1x256xf32, #tpu.memory_space<vmem>>, %arg4: memref<1x16x256xf32, #tpu.memory_space<vmem>>) attributes {dimension_semantics = [#tpu.dimension_semantics<parallel>], iteration_bounds = array<i64: 2>, scalar_prefetch = 0 : i64, scratch_operands = 0 : i64, tpu.core_type = #tpu.core_type<tc>, window_params = [{transform_indices = @transform_0, window_bounds = array<i64: 1, 16, 192>}, {pipeline_mode = #tpu.pipeline_mode<synchronous>, transform_indices = @transform_1, window_bounds = array<i64: 192, 256>}, {pipeline_mode = #tpu.pipeline_mode<synchronous>, transform_indices = @transform_2, window_bounds = array<i64: 1, 256>}, {transform_indices = @transform_3, window_bounds = array<i64: 1, 16, 256>}]} {
    %c0 = arith.constant 0 : index
    %c0_0 = arith.constant 0 : index
    %c0_1 = arith.constant 0 : index
    %0 = vector.load %arg1[%c0, %c0_0, %c0_1] : memref<1x16x192xbf16, #tpu.memory_space<vmem>>, vector<1x16x192xbf16>
    %1 = vector.shape_cast %0 : vector<1x16x192xbf16> to vector<16x192xbf16>
    %c0_2 = arith.constant 0 : index
    %c0_3 = arith.constant 0 : index
    %2 = vector.load %arg2[%c0_2, %c0_3] : memref<192x256xbf16, #tpu.memory_space<vmem>>, vector<192x256xbf16>
    %cst = arith.constant dense<0.000000e+00> : vector<16x256xf32>
    %3 = tpu.matmul %1, %2, %cst {dimension_numbers = #tpu.dot_dimension_numbers<[1], [0], [0], [1], [0, 0, 1, 1], [], []>} : vector<16x192xbf16>, vector<192x256xbf16>, vector<16x256xf32> -> vector<16x256xf32>
    %c0_4 = arith.constant 0 : index
    %c0_5 = arith.constant 0 : index
    %4 = vector.load %arg3[%c0_4, %c0_5] : memref<1x256xf32, #tpu.memory_space<vmem>>, vector<1x256xf32>
    %5 = vector.broadcast %4 : vector<1x256xf32> to vector<16x256xf32>
    %6 = arith.addf %3, %5 : vector<16x256xf32>
    %c0_6 = arith.constant 0 : index
    %c0_7 = arith.constant 0 : index
    %c0_8 = arith.constant 0 : index
    %7 = vector.load %arg4[%c0_6, %c0_7, %c0_8] : memref<1x16x256xf32, #tpu.memory_space<vmem>>, vector<1x16x256xf32>
    %8 = vector.shape_cast %7 : vector<1x16x256xf32> to vector<16x256xf32>
    %9 = vector.shape_cast %6 : vector<16x256xf32> to vector<1x16x256xf32>
    tpu.vector_store %arg4[%c0_6, %c0_7, %c0_8], %9 {strides = array<i32>} : memref<1x16x256xf32, #tpu.memory_space<vmem>>, vector<1x16x256xf32>,
    return
  }
  func.func @transform_0(%arg0: i32) -> (i32, i32, i32) {
    %c0_i32 = arith.constant 0 : i32
    %c0_i32_0 = arith.constant 0 : i32
    %c0_i32_1 = arith.constant 0 : i32
    return %arg0, %c0_i32, %c0_i32_0 : i32, i32, i32
  }
  func.func @transform_1(%arg0: i32) -> (i32, i32) {
    %c0_i32 = arith.constant 0 : i32
    %c0_i32_0 = arith.constant 0 : i32
    %c0_i32_1 = arith.constant 0 : i32
    return %c0_i32, %c0_i32_0 : i32, i32
  }
  func.func @transform_2(%arg0: i32) -> (i32, i32) {
    %c0_i32 = arith.constant 0 : i32
    %c0_i32_0 = arith.constant 0 : i32
    %c0_i32_1 = arith.constant 0 : i32
    return %c0_i32, %c0_i32_0 : i32, i32
  }
  func.func @transform_3(%arg0: i32) -> (i32, i32, i32) {
    %c0_i32 = arith.constant 0 : i32
    %c0_i32_0 = arith.constant 0 : i32
    %c0_i32_1 = arith.constant 0 : i32
    return %arg0, %c0_i32, %c0_i32_0 : i32, i32, i32
  }
}

</mosaic_0001>

<bundles_post_ra>
// kernel: tpu_custom_call.1
= control target key start
LH: loop header
LB: loop body
LE: loop exit
PB: predicated region body
PF: predicated region fallthrough
CT: control target
= control target key end

     0   :  { %7 = vsyncpa [#allocation3], 0  ;;  %s479_s0 = inlined_call_operand.hbm [shape: f32[8,128], index: 0, kind: input, shape index: {}]   ;;  %s480_s1 = inlined_call_operand.hbm [shape: f32[8,128], index: 1, kind: input, shape index: {}]   ;;  %s481_s2 = inlined_call_operand.hbm [shape: f32[8,128], index: 2, kind: output, shape index: {}]  }
   0x1   :  { %8 = vsyncpa [#allocation6], 0 }
   0x2   :  { %9 = vsyncpa [#allocation4], 0  ;;  %s363_s9 = smov 0  }
   0x3 LB: > { %s196_s10 = sadd.s32 4294967295, %s343_s9   ;;  %p197_p0 = scmp.ge.s32.totalorder %s343_s9, 1  ;;  %s343_s9 = sphi %s363_s9, %s15_s9  }
   0x4   : > { %p83_p1 = scmp.lt.s32.totalorder %s343_s9, 3  ;;  %p373_p2 = scmp.eq.s32.totalorder %s196_s10, 0 }
   0x5   : > { %s345_s13 = smov [#allocation2]   ;;  %s346_s15 = smov [#allocation5]  }
   0x6   : > { %s485_s11 = scalar_select %p373_p2, 1, 0 }
   0x7   : > { %p377_p3 = pnand %p197_p0, %p83_p1  ;;  %s96_s14 = sshll.u32 %s345_s13, 4  ;;  %s97_s14 = int_to_ptr.vmem [resolvable:$true] %s96_s14 }
   0x8   : > { %s107_s16 = sshll.u32 %s346_s15, 4  ;;  %s243_s20 = scalar_lea.hbm %s479_s0, 128  ;;  %s389_s16 = int_to_ptr.vmem [resolvable:$true] %s107_s16 }
   0x9   : > { %s486_s12 = scalar_select %p377_p3, 1, 0 }
   0xa   : > { %p219_p4 = pneg %p377_p3  ;;  %p244_p6 = scmp.ne.s32.totalorder %s479_s0, %s243_s20 }
   0xb   : > { %p250_p10 = scmp.lt.u32.totalorder %s243_s20, %s479_s0 }
   0xc   : > { %p385_p5 = pnand %p373_p2, %p219_p4 }
   0xe   : > { %p245_p7 = pneg %p385_p5 }
  0x10   : > { %p246_p8 = pnand %p245_p7, %p244_p6 }
  0x12   : > { %p247_p9 = pneg %p246_p8 }
  0x14   : > { %p252_p11 = pnand %p250_p10, %p247_p9 }
  0x16   : > { %255 = shalt.err (!%p252_p11)
}
  0x17   : > { %s256_s25 = scalar_lea.vmem %s97_s14, 128  ;;  %p264_p1 = scmp.lt.s32.totalorder %s97_s14, %s97_s14 }
  0x18   : > { %p257_p12 = scmp.ne.s32.totalorder %s97_s14, %s256_s25  ;;  %p265_p4 = scmp.lt.s32.totalorder %s256_s25, %s256_s25 }
  0x1a   : > { %p259_p13 = pnand %p257_p12, %p245_p7  ;;  %p266_p2 = por %p265_p4, %p264_p1 }
  0x1c   : > { %p260_p0 = pneg %p259_p13 }
  0x1e   : > { %p267_p3 = pnand %p266_p2, %p260_p0 }
  0x20   : > { %270 = shalt.err (!%p267_p3)
}
  0x21   : > { %222 = dma.hbm_to_vmem [thread:$0]  (!%p385_p5), %s479_s0, 128, %s97_s14, [#allocation3]  }
  0x22   : > { %s271_s30 = scalar_lea.hbm %s480_s1, 128 }
  0x23   : > { %p272_p6 = scmp.ne.s32.totalorder %s480_s1, %s271_s30  ;;  %p278_p3 = scmp.lt.u32.totalorder %s271_s30, %s480_s1 }
  0x25   : > { %p274_p8 = pnand %p272_p6, %p245_p7 }
  0x27   : > { %p275_p2 = pneg %p274_p8 }
  0x29   : > { %p280_p9 = pnand %p278_p3, %p275_p2 }
  0x2b   : > { %283 = shalt.err (!%p280_p9)
}
  0x2c   : > { %s284_s7 = scalar_lea.vmem %s389_s16, 128  ;;  %p292_p13 = scmp.lt.s32.totalorder %s389_s16, %s389_s16 }
  0x2d   : > { %p285_p10 = scmp.ne.s32.totalorder %s389_s16, %s284_s7  ;;  %p293_p0 = scmp.lt.s32.totalorder %s284_s7, %s284_s7 }
  0x2f   : > { %p287_p11 = pnand %p285_p10, %p245_p7  ;;  %p294_p1 = por %p293_p0, %p292_p13 }
  0x31   : > { %p288_p12 = pneg %p287_p11 }
  0x33   : > { %p295_p4 = pnand %p294_p1, %p288_p12 }
  0x35   : > { %298 = shalt.err (!%p295_p4)
}
  0x36   : > { %225 = dma.hbm_to_vmem [thread:$0]  (!%p385_p5), %s480_s1, 128, %s389_s16, [#allocation6]  }
  0x37   : > { %p488_p6 = scmp.ne.s32.totalorder %s486_s12, 0 }
  0x38   : > { %p489_p8 = scmp.ne.s32.totalorder (!%p488_p6), %s485_s11, 0 }
  0x39   : > { %120 = sbr.rel (%p488_p6) target bundleno = 92 (0x5c), region = 28 }
  0x40   : > { %330 = dma.done.wait (%p489_p8), [#allocation3], 128  }
  0x41   : > { %332 = vsyncadd (%p489_p8), [#allocation3], 4294967168 }
  0x42   : > { %334 = dma.done.wait (%p489_p8), [#allocation6], 128  }
  0x43   : > { %336 = vsyncadd (%p489_p8), [#allocation6], 4294967168  ;;  %s347_s14 = smov [#allocation7]   ;;  %v136_v0 = vld [vmem:[#allocation2] sm:$0xff]  ;;  %v137_v1 = vld [vmem:[#allocation5] sm:$0xff]  ;;  %p450_p5 = scmp.eq.s32.totalorder %s196_s10, 1 }
  0x44   : > { %s147_s15 = sshll.u32 %s347_s14, 4  ;;  %v138_v2 = vadd.f32 %v137_v1, %v136_v0  ;;  %s148_s15 = int_to_ptr.vmem [resolvable:$true] %s147_s15 }
  0x45   : > { %s299_s16 = scalar_lea.vmem %s148_s15, 128  ;;  %p306_p9 = scmp.lt.s32.totalorder %s148_s15, %s148_s15 }
  0x46   : > { %139 = vst [vmem:[#allocation7] sm:$0xff] %v138_v2  ;;  %p300_p7 = scmp.ne.s32.totalorder %s148_s15, %s299_s16  ;;  %p307_p10 = scmp.lt.s32.totalorder %s299_s16, %s299_s16 }
  0x48   : > { %p301_p2 = pnand %p300_p7, %p450_p5  ;;  %p308_p11 = por %p307_p10, %p306_p9 }
  0x4a   : > { %p302_p3 = pneg %p301_p2 }
  0x4c   : > { %p309_p12 = pnand %p308_p11, %p302_p3 }
  0x4e   : > { %312 = shalt.err (!%p309_p12)
}
  0x4f   : > { %s313_s10 = scalar_lea.hbm %s481_s2, 128 }
  0x50   : > { %p314_p13 = scmp.ne.s32.totalorder %s481_s2, %s313_s10  ;;  %p319_p4 = scmp.lt.u32.totalorder %s313_s10, %s481_s2 }
  0x52   : > { %p315_p0 = pnand %p314_p13, %p450_p5 }
  0x54   : > { %p316_p1 = pneg %p315_p0 }
  0x56   : > { %p321_p6 = pnand %p319_p4, %p316_p1 }
  0x58   : > { %324 = shalt.err (!%p321_p6)
}
  0x59   : > { %216 = dma.vmem_to_hbm [thread:$0]  (%p450_p5), %s148_s15, 128, %s481_s2, [#allocation4]  }
  0x5a   : > { %338 = dma.done.wait (%p450_p5), [#allocation4], 128  }
  0x5b   : > { %340 = vsyncadd (%p450_p5), [#allocation4], 4294967168 }
  0x5c PF: > { %s15_s9 = sadd.s32 1, %s343_s9  }
  0x5d   : > { %p12_p8 = scmp.ge.s32.totalorder %s15_s9, 4  }
  0x5f   :  { %14 = sbr.rel (!%p12_p8) target bundleno = 3 (0x3), region = 61 }
  0x66   :  { %160 = vsyncpa [#allocation3], 1 }
  0x67   :  { %162 = vsyncpa [#allocation3 + $0x1], 1 }
  0x68   :  { %163 = vsyncpa [#allocation6], 1 }
  0x69   :  { %164 = vsyncpa [#allocation4], 1 }
  0x6a   :  { %166 = vsyncpa [#allocation4 + $0x1], 1 }

// kernel: tpu_custom_call.1
= control target key start
LH: loop header
LB: loop body
LE: loop exit
PB: predicated region body
PF: predicated region fallthrough
CT: control target
= control target key end

     0   :  { %8 = vsyncpa [#allocation3], 0  ;;  %s1129_s0 = inlined_call_operand.hbm [shape: bf16[2,16,192], index: 0, kind: input, shape index: {}]   ;;  %s1130_s1 = inlined_call_operand.hbm [shape: bf16[192,256], index: 1, kind: input, shape index: {}]   ;;  %s1131_s2 = inlined_call_operand.hbm [shape: f32[1,256], index: 2, kind: input, shape index: {}]   ;;  %s1132_s3 = inlined_call_operand.hbm [shape: f32[2,16,256], index: 3, kind: output, shape index: {}]  }
   0x1   :  { %10 = vsyncpa [#allocation3 + $0x1], 0 }
   0x2   :  { %11 = vsyncpa [#allocation6], 0 }
   0x3   :  { %12 = vsyncpa [#allocation4], 0 }
   0x4   :  { %14 = vsyncpa [#allocation4 + $0x1], 0  ;;  %s884_s12 = smov 0   ;;  %s886_s13 = smov 0  }
   0x5   :  { %s888_s14 = smov 0   ;;  %s890_s15 = smov 0  }
   0x6 LB: > { %s905_s16 = sadd.s32 4294967295, %s854_s15   ;;  %s541_s17 = sadd.s32 4294967294, %s854_s15   ;;  %s854_s15 = sphi %s890_s15, %s1152_s15   ;;  %s850_s14 = sphi %s888_s14, %s1151_s14   ;;  %s846_s13 = sphi %s886_s13, %s1150_s13   ;;  %s842_s12 = sphi %s884_s12, %s1149_s12  }
   0x7   : > { %p40_p0 = scmp.ne.s32.totalorder %s846_s13, %s842_s12  ;;  %p1133_p1 = scmp.eq.s32.totalorder %s905_s16, 0 }
   0x8   : > { %p112_p3 = scmp.eq.s32.totalorder %s541_s17, 1  ;;  %p542_p5 = scmp.ge.s32.totalorder %s854_s15, 1 }
   0x9   : > { %p914_p4 = por %p1133_p1, %p40_p0  ;;  %p119_p7 = scmp.lt.s32.totalorder %s854_s15, 3 }
   0xa   : > { %p919_p6 = por %p112_p3, %p40_p0  ;;  %s856_s21 = smov [#allocation5]  }
   0xb   : > { %s1136_s18 = scalar_select %p914_p4, 1, 0 }
   0xc   : > { %s1137_s19 = scalar_select %p919_p6, 1, 0 }
   0xd   : > { %p924_p8 = pnand %p542_p5, %p119_p7  ;;  %s131_s22 = sshll.u32 %s856_s21, 4  ;;  %s928_s22 = int_to_ptr.vmem [resolvable:$true] %s131_s22 }
   0xe   : > { %s857_s24 = smov [#allocation7]   ;;  %s698_s28 = scalar_lea.hbm %s1130_s1, 3072 }
   0xf   : > { %p600_p9 = pneg %p924_p8  ;;  %s145_s25 = sshll.u32 %s857_s24, 4  ;;  %s939_s25 = int_to_ptr.vmem [resolvable:$true] %s145_s25 }
  0x10   : > { %p699_p12 = scmp.ne.s32.totalorder %s1130_s1, %s698_s28  ;;  %p705_p5 = scmp.lt.u32.totalorder %s698_s28, %s1130_s1 }
  0x11   : > { %p935_p11 = pnand %p600_p9, %p1133_p1 }
  0x13   : > { %p700_p13 = pneg %p935_p11 }
  0x15   : > { %p701_p0 = pnand %p700_p13, %p699_p12 }
  0x17   : > { %p702_p3 = pneg %p701_p0 }
  0x19   : > { %p707_p7 = pnand %p705_p5, %p702_p3 }
  0x1b   : > { %710 = shalt.err (!%p707_p7)
}
  0x1c   : > { %s711_s6 = scalar_lea.vmem %s928_s22, 3072  ;;  %p719_p2 = scmp.lt.s32.totalorder %s928_s22, %s928_s22 }
  0x1d   : > { %p712_p9 = scmp.ne.s32.totalorder %s928_s22, %s711_s6  ;;  %p720_p12 = scmp.lt.s32.totalorder %s711_s6, %s711_s6 }
  0x1f   : > { %p714_p10 = pnand %p712_p9, %p700_p13  ;;  %p721_p0 = por %p720_p12, %p719_p2 }
  0x21   : > { %p715_p1 = pneg %p714_p10 }
  0x23   : > { %p722_p6 = pnand %p721_p0, %p715_p1 }
  0x25   : > { %725 = shalt.err (!%p722_p6)
}
  0x26   : > { %s858_s7 = smov 128   ;;  %s859_s8 = smov 8  }
  0x27   : > { %603 = dma.hbm_to_vmem [thread:$0]  (!%p935_p11), %s1130_s1, 3072, %s928_s22, [#allocation6], %s858_s7, %s858_s7, %s859_s8  }
  0x28   : > { %s726_s21 = scalar_lea.hbm %s1131_s2, 32 }
  0x29   : > { %p727_p1 = scmp.ne.s32.totalorder %s1131_s2, %s726_s21  ;;  %p733_p10 = scmp.lt.u32.totalorder %s726_s21, %s1131_s2 }
  0x2b   : > { %p729_p2 = pnand %p727_p1, %p700_p13 }
  0x2d   : > { %p730_p6 = pneg %p729_p2 }
  0x2f   : > { %p735_p3 = pnand %p733_p10, %p730_p6 }
  0x31   : > { %738 = shalt.err (!%p735_p3)
}
  0x32   : > { %s739_s22 = scalar_lea.vmem %s939_s25, 32  ;;  %p747_p12 = scmp.lt.s32.totalorder %s939_s25, %s939_s25 }
  0x33   : > { %p740_p5 = scmp.ne.s32.totalorder %s939_s25, %s739_s22  ;;  %p748_p0 = scmp.lt.s32.totalorder %s739_s22, %s739_s22 }
  0x35   : > { %p742_p7 = pnand %p740_p5, %p700_p13  ;;  %p749_p1 = por %p748_p0, %p747_p12 }
  0x37   : > { %p743_p9 = pneg %p742_p7 }
  0x39   : > { %p750_p2 = pnand %p749_p1, %p743_p9 }
  0x3b   : > { %753 = shalt.err (!%p750_p2)
}
  0x3c   : > { %606 = dma.hbm_to_vmem [thread:$0]  (!%p935_p11), %s1131_s2, 32, %s939_s25, [#allocation6]  }
  0x3d   : > { %s997_s4 = sadd.s32 1, %s854_s15   ;;  %s27_s23 = sadd.s32 1, %s850_s14 }
  0x3e   : > { %s24_s5 = ssub.s32 %s854_s15, %s997_s4  ;;  %p34_p13 = scmp.ne.s32.totalorder %s850_s14, %s846_s13 }
  0x3f   : > { %p25_p6 = scmp.eq.s32.totalorder %s24_s5, 0  ;;  %p35_p10 = scmp.eq.s32.totalorder %s854_s15, 0 }
  0x40   : > { %p1140_p3 = scmp.eq.s32.totalorder %s905_s16, 1  ;;  %p617_p7 = scmp.lt.s32.totalorder %s854_s15, 2 }
  0x41   : > { %s1013_s9 = scalar_select %p25_p6, %s850_s14, %s27_s23  }
  0x42   : > { %p1007_p5 = por %p1140_p3, %p34_p13  ;;  %p36_p9 = por %p35_p10, %p34_p13 }
  0x43   : > { %s156_s10 = sand.u32 1, %s850_s14   ;;  %s586_s25 = sshll.u32 %s854_s15, 8 }
  0x44   : > { %s1141_s6 = scalar_select %p1007_p5, 1, 0 }
  0x45   : > { %s546_s11 = sshll.u32 %s156_s10, 4  ;;  %s1020_s24 = scalar_lea.hbm %s1129_s0, %s586_s25 }
  0x46   : > { %s160_s26 = scalar_lea.vmem [#allocation2], %s546_s11  ;;  %p1024_p11 = pnand %p617_p7, %p36_p9 }
  0x47   : > { %s167_s27 = sshll.u32 %s160_s26, 4  ;;  %s1028_s22 = scalar_lea.sflag [#allocation3], %s156_s10  ;;  %s1022_s27 = int_to_ptr.vmem [resolvable:$true] %s167_s27 }
  0x48   : > { %s754_s29 = scalar_lea.hbm %s1020_s24, 256  ;;  %p756_p0 = pneg %p1024_p11 }
  0x49   : > { %p755_p12 = scmp.ne.s32.totalorder %s1020_s24, %s754_s29  ;;  %s759_s5 = scalar_lea.hbm %s1129_s0, 512 }
  0x4a   : > { %p760_p13 = scmp.lt.u32.totalorder %s1020_s24, %s1129_s0  ;;  %p761_p6 = scmp.lt.u32.totalorder %s759_s5, %s754_s29 }
  0x4b   : > { %p757_p1 = pnand %p756_p0, %p755_p12  ;;  %p763_p3 = scmp.lt.u32.totalorder %s754_s29, %s1020_s24 }
  0x4c   : > { %p762_p10 = por %p761_p6, %p760_p13 }
  0x4d   : > { %p758_p2 = pneg %p757_p1 }
  0x4e   : > { %p764_p7 = por %p763_p3, %p762_p10 }
  0x50   : > { %p765_p9 = pnand %p764_p7, %p758_p2 }
  0x52   : > { %768 = shalt.err (!%p765_p9)
}
  0x53   : > { %s769_s10 = scalar_lea.vmem %s1022_s27, 256  ;;  %s860_s17 = smov [#allocation2]  }
  0x54   : > { %p770_p12 = scmp.ne.s32.totalorder %s1022_s27, %s769_s10  ;;  %s774_s21 = sshll.u32 %s860_s17, 4  ;;  %s775_s21 = int_to_ptr.vmem [resolvable:$false] %s774_s21 }
  0x55   : > { %s776_s26 = scalar_lea.vmem %s775_s21, 512  ;;  %p777_p4 = scmp.lt.s32.totalorder %s1022_s27, %s775_s21 }
  0x56   : > { %p772_p1 = pnand %p770_p12, %p756_p0  ;;  %p778_p13 = scmp.lt.s32.totalorder %s776_s26, %s769_s10 }
  0x58   : > { %p773_p5 = pneg %p772_p1  ;;  %p779_p6 = por %p778_p13, %p777_p4 }
  0x5a   : > { %p780_p10 = pnand %p779_p6, %p773_p5 }
  0x5c   : > { %783 = shalt.err (!%p780_p10)
}
  0x5d   : > { %610 = dma.hbm_to_vmem [thread:$0]  (!%p1024_p11), %s1020_s24, 256, %s1022_s27, %s1028_s22, %s858_s7, %s858_s7, %s859_s8  }
  0x5e   : > { %179 = sbr.rel (%p924_p8) target bundleno = 386 (0x182), region = 32  ;;  %s1062_s29 = sand.u32 (!%p924_p8), 1, %s846_s13  }
  0x5f   : > { %s550_s30 = sshll.u32 (!%p924_p8), %s1062_s29, 4  ;;  %s182_s23 = scalar_lea.sflag (!%p924_p8), [#allocation3], %s1062_s29 }
  0x60   : > { %s1066_s5 = scalar_lea.vmem (!%p924_p8), [#allocation2], %s550_s30  ;;  %p1143_p4 = scmp.ne.s32.totalorder (!%p924_p8), %s1136_s18, 0 }
  0x65   : > { %829 = dma.done.wait (%p1143_p4), %s182_s23, 256  }
  0x66   : > { %831 = vsyncadd (%p1143_p4), %s182_s23, 4294967040  ;;  %p1144_p5 = scmp.eq.s32.totalorder %s905_s16, 0 }
  0x68   : > { %833 = dma.done.wait (%p1144_p5), [#allocation6], 3104   ;;  %p1145_p8 = pmov %p1144_p5 }
  0x69   : > { %v659_v0 = vld [vmem:[#allocation5 + $0x4] ss:$8 sps:$4 sm:$0xff]   ;;  %v661_v1 = vld [vmem:[#allocation5] ss:$8 sps:$4 sm:$0xff]   ;;  %v662_v2 = vld [vmem:[#allocation5 + $0x14] ss:$8 sps:$4 sm:$0xff]   ;;  %v245_v26 = vlaneseq }
  0x6a   : > { %835 = vsyncadd (%p1145_p8), [#allocation6], 4294964192  ;;  %388 = vmatprep.subr.bf16.mxu0 %v659_v0  ;;  %v664_v3 = vld [vmem:[#allocation5 + $0x10] ss:$8 sps:$4 sm:$0xff]   ;;  %v665_v4 = vld [vmem:[#allocation5 + $0x24] ss:$8 sps:$4 sm:$0xff]  }
  0x6b   : > { %389 = vmatpush1.bf16.msra.mxu0 %v661_v1  ;;  %v667_v5 = vld [vmem:[#allocation5 + $0x20] ss:$8 sps:$4 sm:$0xff]   ;;  %v668_v6 = vld [vmem:[#allocation5 + $0x34] ss:$8 sps:$4 sm:$0xff]   ;;  %v670_v7 = vld [vmem:[#allocation5 + $0x30] ss:$8 sps:$4 sm:$0xff]  }
  0x6c   : > { %390 = vmatprep.subr.bf16.mxu0 %v662_v2  ;;  %v671_v8 = vld [vmem:[#allocation5 + $0x44] ss:$8 sps:$4 sm:$0xff]   ;;  %v673_v9 = vld [vmem:[#allocation5 + $0x40] ss:$8 sps:$4 sm:$0xff]   ;;  %v674_v10 = vld [vmem:[#allocation5 + $0x54] ss:$8 sps:$4 sm:$0xff]  }
  0x6d   : > { %vm384_vm0 = vcmask 523264   ;;  %v697_v11 = vld [vmem:[%s1066_s5 + $0x4] ss:$8 sps:$4 sm:$0xff]   ;;  %v676_v12 = vld [vmem:[#allocation5 + $0x50] ss:$8 sps:$4 sm:$0xff]   ;;  %v246_v27 = vshrl.u32 %v245_v26, 7 }
  0x6e   : > { %580 = vmatprep.mubr.msk.bf16.mxu0 %vm384_vm0, %v697_v11  ;;  %v677_v13 = vld [vmem:[#allocation5 + $0x64] ss:$8 sps:$4 sm:$0xff]   ;;  %v679_v14 = vld [vmem:[#allocation5 + $0x60] ss:$8 sps:$4 sm:$0xff]   ;;  %v680_v15 = vld [vmem:[#allocation5 + $0x74] ss:$8 sps:$4 sm:$0xff]  }
  0x6f   : > { %391 = vmatpush1.bf16.msra.mxu0 %v664_v3  ;;  %v682_v16 = vld [vmem:[#allocation5 + $0x70] ss:$8 sps:$4 sm:$0xff]   ;;  %v683_v17 = vld [vmem:[#allocation5 + $0x84] ss:$8 sps:$4 sm:$0xff]   ;;  %v685_v18 = vld [vmem:[#allocation5 + $0x80] ss:$8 sps:$4 sm:$0xff]  }
  0x70   : > { %392 = vmatprep.subr.bf16.mxu0 %v665_v4  ;;  %v686_v19 = vld [vmem:[#allocation5 + $0x94] ss:$8 sps:$4 sm:$0xff]   ;;  %v688_v20 = vld [vmem:[#allocation5 + $0x90] ss:$8 sps:$4 sm:$0xff]   ;;  %v689_v21 = vld [vmem:[#allocation5 + $0xa4] ss:$8 sps:$4 sm:$0xff]  }
  0x71   : > { %v691_v22 = vld [vmem:[#allocation5 + $0xa0] ss:$8 sps:$4 sm:$0xff]   ;;  %v692_v23 = vld [vmem:[#allocation5 + $0xb4] ss:$8 sps:$4 sm:$0xff]   ;;  %v694_v24 = vld [vmem:[#allocation5 + $0xb0] ss:$8 sps:$4 sm:$0xff]  }
  0x72   : > { %v695_v25 = vld [vmem:[%s1066_s5] ss:$8 sps:$4 sm:$0xff]   ;;  %v247_v28 = vsub.s32 0, %v246_v27  ;;  %v251_v30 = vsub.s32 1, %v246_v27  ;;  %s553_s18 = sshll.u32 %s1062_s29, 5  ;;  %s587_s8 = sshll.u32 %s905_s16, 9 }
  0x73   : > { %393 = vmatpush1.bf16.msra.mxu0 %v667_v5  ;;  %v243_v29 = vld [vmem:[#allocation7] sm:$0x3]  ;;  %s215_s20 = scalar_lea.vmem [#allocation8], %s553_s18  ;;  %s1085_s28 = scalar_lea.hbm %s1132_s3, %s587_s8 }
  0x74   : > { %394 = vmatprep.subr.bf16.mxu0 %v668_v6  ;;  %v248_v31 = vrot.slane %v243_v29, %v247_v28  ;;  %v252_v32 = vrot.slane %v243_v29, %v251_v30  ;;  %s449_s7 = sshll.u32 %s215_s20, 4  ;;  %s436_s16 = scalar_lea.sflag [#allocation4], %s1062_s29  ;;  %s1080_s7 = int_to_ptr.vmem [resolvable:$true] %s449_s7 }
  0x75   : > { %s784_s22 = scalar_lea.vmem %s1080_s7, 512  ;;  %p1146_p0 = scmp.ne.s32.totalorder %s1141_s6, 0 }
  0x76   : > { %p785_p11 = scmp.ne.s32.totalorder %s1080_s7, %s784_s22  ;;  %s861_s11 = smov [#allocation8]  }
  0x77   : > { %395 = vmatpush1.bf16.msra.mxu0 %v670_v7  ;;  %s788_s25 = sshll.u32 %s861_s11, 4  ;;  %s789_s25 = int_to_ptr.vmem [resolvable:$false] %s788_s25 }
  0x78   : > { %396 = vmatprep.subr.bf16.mxu0 %v671_v8  ;;  %p786_p2 = pnand %p785_p11, %p1146_p0  ;;  %s790_s10 = scalar_lea.vmem %s789_s25, 1024 }
  0x79   : > { %p791_p7 = scmp.lt.s32.totalorder %s1080_s7, %s789_s25  ;;  %p792_p9 = scmp.lt.s32.totalorder %s790_s10, %s784_s22 }
  0x7a   : > { %p787_p3 = pneg %p786_p2 }
  0x7b   : > { %397 = vmatpush1.bf16.msra.mxu0 %v673_v9  ;;  %p793_p12 = por %p792_p9, %p791_p7 }
  0x7c   : > { %398 = vmatprep.subr.bf16.mxu0 %v674_v10 }
  0x7d   : > { %p794_p1 = pnand %p793_p12, %p787_p3 }
  0x7f   : > { %399 = vmatpush1.bf16.msra.mxu0 %v676_v12 }
  0x80   : > { %400 = vmatprep.subr.bf16.mxu0 %v677_v13 }
  0x83   : > { %401 = vmatpush1.bf16.msra.mxu0 %v679_v14 }
  0x84   : > { %402 = vmatprep.subr.bf16.mxu0 %v680_v15 }
  0x87   : > { %403 = vmatpush1.bf16.msra.mxu0 %v682_v16 }
  0x88   : > { %404 = vmatprep.subr.bf16.mxu0 %v683_v17 }
  0x8b   : > { %405 = vmatpush1.bf16.msra.mxu0 %v685_v18 }
  0x8c   : > { %406 = vmatprep.subr.bf16.mxu0 %v686_v19 }
  0x8f   : > { %407 = vmatpush1.bf16.msra.mxu0 %v688_v20 }
  0x90   : > { %408 = vmatprep.subr.bf16.mxu0 %v689_v21 }
  0x93   : > { %409 = vmatpush1.bf16.msra.mxu0 %v691_v22 }
  0x94   : > { %410 = vmatprep.subr.bf16.mxu0 %v692_v23 }
  0x97   : > { %411 = vmatpush1.bf16.msra.mxu0 %v694_v24 }
  0x9a   : > { %421 = vmatmul.mubr.bf16.vlgmr.msra.gmra.mrb[0].mxu0 %v695_v25 }
 0x16d   : > { %v422_v33 = vpop.f32.mrb[0].mxu0 }
 0x16e   : > { %v423_v34 = vadd.f32 %v422_v33, %v248_v31  ;;  %v424_v35 = vpop.f32.mrb[1].mxu0 }
 0x16f   : > { %v425_v36 = vadd.f32 %v424_v35, %v252_v32  ;;  %v426_v37 = vpop.f32.mrb[2].mxu0 }
 0x170   : > { %431 = vst [vmem:[%s215_s20] sm:$0xff] %v423_v34  ;;  %v427_v38 = vadd.f32 %v426_v37, %v248_v31  ;;  %v428_v39 = vpop.f32.mrb[3].mxu0 }
 0x171   : > { %432 = vst [vmem:[%s215_s20 + $0x8] sm:$0xff] %v425_v36  ;;  %v429_v40 = vadd.f32 %v428_v39, %v252_v32 }
 0x172   : > { %433 = vst [vmem:[%s215_s20 + $0x10] sm:$0xff] %v427_v38 }
 0x173   : > { %434 = vst [vmem:[%s215_s20 + $0x18] sm:$0xff] %v429_v40 }
 0x174   : > { %797 = shalt.err (!%p794_p1)
}
 0x175   : > { %s798_s17 = scalar_lea.hbm %s1085_s28, 512  ;;  %s802_s30 = scalar_lea.hbm %s1132_s3, 1024 }
 0x176   : > { %p799_p13 = scmp.ne.s32.totalorder %s1085_s28, %s798_s17  ;;  %p803_p4 = scmp.lt.u32.totalorder %s1085_s28, %s1132_s3 }
 0x177   : > { %p804_p5 = scmp.lt.u32.totalorder %s802_s30, %s798_s17  ;;  %p806_p11 = scmp.lt.u32.totalorder %s798_s17, %s1085_s28 }
 0x178   : > { %p800_p6 = pnand %p799_p13, %p1146_p0 }
 0x179   : > { %p805_p8 = por %p804_p5, %p803_p4 }
 0x17a   : > { %p801_p10 = pneg %p800_p6 }
 0x17b   : > { %p807_p2 = por %p806_p11, %p805_p8 }
 0x17d   : > { %p808_p3 = pnand %p807_p2, %p801_p10 }
 0x17f   : > { %811 = shalt.err (!%p808_p3)
}
 0x180   : > { %s862_s18 = smov 256   ;;  %s863_s20 = smov 16  }
 0x181   : > { %598 = dma.vmem_to_hbm [thread:$0]  (%p1146_p0), %s1080_s7, 512, %s1085_s28, %s436_s16, %s862_s18, %s862_s18, %s863_s20  }
 0x182 PF: > { %s464_s8 = sand.u32 1, %s842_s12   ;;  %p1147_p7 = scmp.ne.s32.totalorder %s1137_s19, 0 }
 0x183   : > { %p1148_p9 = scmp.ge.s32.totalorder %s854_s15, 2  ;;  %s465_s24 = scalar_lea.sflag [#allocation4], %s464_s8 }
 0x185   : > { %p612_p12 = pnand %p1148_p9, %p1147_p7 }
 0x187   : > { %837 = dma.done.wait (!%p612_p12), %s465_s24, 512  }
 0x188   : > { %839 = vsyncadd (!%p612_p12), %s465_s24, 4294966784  ;;  %p17_p1 = scmp.ge.s32.totalorder %s997_s4, 4   ;;  %s1149_s12 = smov %s846_s13 }
 0x189   : > { %s1150_s13 = smov %s850_s14  ;;  %s1151_s14 = smov %s1013_s9 }
 0x18a   : > { %s1152_s15 = smov %s997_s4  ;;  %19 = sbr.rel (!%p17_p1) target bundleno = 6 (0x6), region = 85 }
 0x191   :  { %470 = vsyncpa [#allocation3], 1 }
 0x192   :  { %472 = vsyncpa [#allocation3 + $0x1], 1 }
 0x193   :  { %473 = vsyncpa [#allocation6], 1 }
 0x194   :  { %474 = vsyncpa [#allocation4], 1 }
 0x195   :  { %476 = vsyncpa [#allocation4 + $0x1], 1 }

</bundles_post_ra>
